<compile_context>
chip_gen: v5e
topology: v5e:2x2
jax: 0.10.0
libtpu: 0.0.40
codegen_flags: <defaults>
</compile_context>

<pallas_src>
import functools

import numpy as np
import jax
import jax.numpy as jnp
from jax.experimental import pallas as pl
from jax.experimental.pallas import tpu as pltpu


# Lane-dense D tile (multiple of 128).  Sized so that even on v7x (64 MiB physical /
# 32 MiB scoped VMEM) the double-buffered (K,TILE_D)+(1,TILE_D) tiles use a tiny
# fraction of VMEM while still hitting ~85% of HBM roofline (512-1024 lane tiles).
_DEFAULT_TILE_D = 512
_VMEM_LIMIT_BYTES = 32 * 1024 * 1024   # explicit, with headroom, works on v5e/v6e/v7x


def _choose_tile_d(d, max_tile=_DEFAULT_TILE_D):
    """Largest multiple-of-128 tile <= max_tile that divides d (else the full d)."""
    if d <= max_tile or d % 128 != 0:
        return d
    t = (max_tile // 128) * 128
    while t >= 128:
        if d % t == 0:
            return t
        t -= 128
    return d


# ---------------------------------------------------------------------------
# decode: theta[b] = mus[dist_idx[b]] + direction[b] * sigma * epsilon[b]
# ---------------------------------------------------------------------------

def _decode_kernel(idx_ref, dirs_ref, sig_ref, mu_ref, eps_ref, out_ref):
    # mu_ref is already the gathered (1, 1, TILE_D) row (scalar-prefetch index_map), so
    # there is no in-kernel dynamic row select and only 1/K of mus is DMA'd from HBM.
    b = pl.program_id(0)
    out_ref[...] = mu_ref[...] + (dirs_ref[b] * sig_ref[0]) * eps_ref[...]


def decode_pallas(mus, epsilons, dist_idx, directions, sigma):
    """Batched decode. epsilons: (B, D); dist_idx: (B,) int; directions: (B,) float."""
    K, D = mus.shape
    epsilons = jnp.asarray(epsilons, jnp.float32).reshape(-1, D)
    B = epsilons.shape[0]
    idx = jnp.asarray(dist_idx, jnp.int32).reshape(-1)
    dirs = jnp.asarray(directions, jnp.float32).reshape(-1)
    sig = jnp.asarray([sigma], dtype=jnp.float32)

    tile_d = _choose_tile_d(D)
    nd = D // tile_d

    # Singleton sublane dim so the per-row gather happens on a *leading* block dim
    # (no (8,128) constraint there); last two block dims stay (1, tile_d): lane-dense.
    mus3 = mus.reshape(K, 1, D)
    eps3 = epsilons.reshape(B, 1, D)

    out = pl.pallas_call(
        _decode_kernel,
        out_shape=jax.ShapeDtypeStruct((B, 1, D), jnp.float32),
        grid_spec=pltpu.PrefetchScalarGridSpec(
            num_scalar_prefetch=1,                    # idx lands in SMEM, feeds index_maps
            grid=(B, nd),
            in_specs=[
                pl.BlockSpec(memory_space=pltpu.MemorySpace.SMEM),   # directions (B,)
                pl.BlockSpec(memory_space=pltpu.MemorySpace.SMEM),   # [sigma]
                pl.BlockSpec((1, 1, tile_d),
                             lambda b, d, idx_ref: (idx_ref[b], 0, d)),   # gathered mu row
                pl.BlockSpec((1, 1, tile_d),
                             lambda b, d, idx_ref: (b, 0, d)),            # epsilon row
            ],
            out_specs=pl.BlockSpec((1, 1, tile_d),
                                   lambda b, d, idx_ref: (b, 0, d)),
        ),
        compiler_params=pltpu.CompilerParams(
            dimension_semantics=("parallel", "parallel"),
            vmem_limit_bytes=_VMEM_LIMIT_BYTES,
        ),
    )(idx, dirs, sig, mus3, eps3)
    return out.reshape(B, D)


# ---------------------------------------------------------------------------
# ProbRatio.backward as a fused two-phase Pallas kernel
# ---------------------------------------------------------------------------

def _prob_ratio_grad_kernel(idx_ref, scal_ref, mus_ref, eps_ref, out_ref,
                            sq_sc, scale_sc):
    # Grid = (phase, d_tile), both "arbitrary":
    #   phase 0: accumulate sq_k = sum_d eps_k^2 into (K, 1) scratch
    #   phase 1: at d == 0 compute the factored denominator + per-k scale once,
    #            then write each lane-dense (K, TILE_D) output tile with one multiply.
    phase = pl.program_id(0)
    d = pl.program_id(1)

    sigma = scal_ref[0]
    direction = scal_ref[1]
    go = scal_ref[2]
    sigma2 = sigma * sigma

    # Decode fused into the backward: theta tile recomputed here instead of a separate
    # decode launch + (1, D) HBM round-trip.
    mu_sel = mus_ref[pl.ds(idx_ref[0], 1), :]               # (1, TILE_D)
    theta = mu_sel + (direction * sigma) * eps_ref[...]     # (1, TILE_D)
    e = theta - mus_ref[...]                                # (K, TILE_D)
    # NOTE: K < 8 leaves sublanes underfilled; padding K to 8 (masked) would raise
    # VPU/vld occupancy but is unnecessary at these sizes.

    @pl.when(phase == 0)
    def _():
        @pl.when(d == 0)
        def _():
            sq_sc[...] = jnp.zeros_like(sq_sc)
        sq_sc[...] = sq_sc[...] + jnp.sum(e * e, axis=-1, keepdims=True)

    @pl.when(phase == 1)
    def _():
        @pl.when(d == 0)
        def _():
            # Factored, min-shifted denominator: K exps instead of a (K, K) exp matrix,
            # no XLU transpose, better conditioned as sigma -> sigma_limit.
            sq = sq_sc[...]                                  # (K, 1)
            s_min = jnp.min(sq)
            w = jnp.exp(-0.5 * (sq - s_min) / sigma2)        # (K, 1)
            s_tot = jnp.sum(w)
            # denom_k = s_tot / w_k   =>   scale_k = go * w_k / (sigma^2 * s_tot)
            denom = (sigma2 * s_tot) * jnp.ones_like(w)      # (K, 1)
            scale_sc[...] = (go * w) * pl.reciprocal(denom, approx=True)
        # Single multiply per element instead of two full-size divides.
        out_ref[...] = e * scale_sc[...]


def prob_ratio_grad_pallas(mus, epsilon, dist_idx, direction, sigma, grad_output):
    K, D = mus.shape
    tile_d = _choose_tile_d(D)
    nd = D // tile_d

    idx = jnp.asarray([dist_idx], dtype=jnp.int32)
    scal = jnp.stack([jnp.asarray(sigma, jnp.float32),
                      jnp.asarray(direction, jnp.float32),
                      jnp.asarray(grad_output, jnp.float32).reshape(())])
    eps2d = jnp.asarray(epsilon, jnp.float32).reshape(1, D)

    return pl.pallas_call(
        _prob_ratio_grad_kernel,
        out_shape=jax.ShapeDtypeStruct((K, D), jnp.float32),
        grid_spec=pltpu.PrefetchScalarGridSpec(
            num_scalar_prefetch=0,
            grid=(2, nd),                                    # (phase, D tiles)
            in_specs=[
                pl.BlockSpec(memory_space=pltpu.MemorySpace.SMEM),   # [dist_idx]
                pl.BlockSpec(memory_space=pltpu.MemorySpace.SMEM),   # [sigma, direction, g]
                pl.BlockSpec((K, tile_d), lambda p, d: (0, d)),      # mus tile
                pl.BlockSpec((1, tile_d), lambda p, d: (0, d)),      # epsilon tile
            ],
            # During phase 0 the output block index stays (0, 0) so nothing is written
            # back; phase 1 visits each lane-dense (K, tile_d) tile exactly once.
            out_specs=pl.BlockSpec((K, tile_d), lambda p, d: (0, d * p)),
            scratch_shapes=[pltpu.VMEM((K, 1), jnp.float32),   # sum(eps^2) per component
                            pltpu.VMEM((K, 1), jnp.float32)],  # per-component scale
        ),
        compiler_params=pltpu.CompilerParams(
            dimension_semantics=("arbitrary", "arbitrary"),
            vmem_limit_bytes=_VMEM_LIMIT_BYTES,
        ),
    )(idx, scal, mus, eps2d)


# ---------------------------------------------------------------------------
# ProbRatio as a custom_vjp (forward = constant ones(1), backward = Pallas kernel)
# ---------------------------------------------------------------------------

_ONES_CACHE = None


def _ones1():
    # ProbRatio.forward returns torch.ones(1): a constant -> no kernel launch.
    global _ONES_CACHE
    if _ONES_CACHE is None:
        _ONES_CACHE = jnp.ones((1,), dtype=jnp.float32)
    return _ONES_CACHE


@functools.partial(jax.custom_vjp, nondiff_argnums=(2, 3, 4))
def prob_ratio(mus, epsilon, dist_idx, direction, sigma):
    del mus, epsilon
    return _ones1()


def _prob_ratio_fwd(mus, epsilon, dist_idx, direction, sigma):
    del dist_idx, direction, sigma
    return _ones1(), (mus, epsilon)


def _prob_ratio_bwd(dist_idx, direction, sigma, res, g):
    mus, epsilon = res
    grad_mus = prob_ratio_grad_pallas(mus, epsilon, dist_idx, direction, sigma, g)
    # epsilon never needs a gradient in this module (torch decode runs under no_grad).
    return (grad_mus, jnp.zeros_like(epsilon))


prob_ratio.defvjp(_prob_ratio_fwd, _prob_ratio_bwd)


# ---------------------------------------------------------------------------
# Module wrapper
# ---------------------------------------------------------------------------

class MixtureNormalPallas:
    """JAX/Pallas port of MixtureNormal (ProbRatio forward/backward + decode)."""

    def __init__(self, init_mus, sigma=0.02, sigma_decay=1.0, sigma_limit=0.001):
        self.mus = jnp.asarray(init_mus, dtype=jnp.float32)   # (K, D) parameter
        self.dims = self.mus.shape[1]
        self.sigma = float(sigma)
        self.sigma_decay = float(sigma_decay)
        self.sigma_limit = float(sigma_limit)

    def step(self):
        self.sigma *= self.sigma_decay
        if self.sigma < self.sigma_limit:
            self.sigma = self.sigma_limit

    def decode(self, descriptor):
        # descriptor = (epsilon, dist_idx, direction); epsilon replaces noise.get(...)
        epsilon, dist_idx, direction = descriptor
        theta = decode_pallas(self.mus,
                              jnp.asarray(epsilon, jnp.float32).reshape(1, self.dims),
                              jnp.asarray([dist_idx], jnp.int32),
                              jnp.asarray([direction], jnp.float32),
                              self.sigma)
        return theta.reshape(self.dims)

    def decode_batch(self, epsilons, dist_idx, directions):
        """Decode B descriptors in one pallas_call (amortizes dispatch; v7x splits B)."""
        return decode_pallas(self.mus, epsilons, dist_idx, directions, self.sigma)

    def ratio(self, descriptor):
        epsilon, dist_idx, direction = descriptor
        return prob_ratio(self.mus, jnp.asarray(epsilon, jnp.float32),
                          int(dist_idx), float(direction), float(self.sigma))

    def forward(self, descriptor):
        return self.ratio(descriptor)

    def eval_theta(self):
        return [self.mus[i] for i in range(self.mus.shape[0])]


# ---------------------------------------------------------------------------
# Main
# ---------------------------------------------------------------------------

if __name__ == "__main__":
    key = jax.random.PRNGKey(0)
    K, D, B = 4, 1024, 4          # tile_d = 512 -> grid exercises D tiling + two phases
    sigma = 0.5

    k1, k2 = jax.random.split(key)
    init_mus = 0.05 * jax.random.normal(k1, (K, D), dtype=jnp.float32)
    module = MixtureNormalPallas(init_mus, sigma=sigma)

    epsilons = jax.random.normal(k2, (B, D), dtype=jnp.float32)
    dist_inds = jnp.array([1, 0, 3, 2], dtype=jnp.int32)
    directions = jnp.array([1.0, -1.0, 1.0, -1.0], dtype=jnp.float32)

    # Batched decode: B descriptors in one pallas_call.
    thetas = jax.block_until_ready(module.decode_batch(epsilons, dist_inds, directions))
    mus_np = np.asarray(module.mus)
    ref_thetas = (mus_np[np.asarray(dist_inds)]
                  + np.asarray(directions)[:, None] * sigma * np.asarray(epsilons))
    np.testing.assert_allclose(np.asarray(thetas), ref_thetas, rtol=1e-5, atol=1e-6)

    # Single-descriptor decode (same kernel, B = 1).
    descriptor = (epsilons[0], 1, +1)
    theta0 = jax.block_until_ready(module.decode(descriptor))
    np.testing.assert_allclose(np.asarray(theta0), ref_thetas[0], rtol=1e-5, atol=1e-6)

    # Forward pass (ProbRatio.forward): constant ones(1), no kernel launch.
    out = jax.block_until_ready(module.forward(descriptor))
    assert out.shape == (1,) and float(out[0]) == 1.0

    # Backward pass (ProbRatio.backward) exercised via jax.grad -> fused Pallas kernel.
    eps0 = epsilons[0]
    grads = jax.grad(lambda m: jnp.sum(prob_ratio(m, eps0, 1, 1.0, sigma)))(module.mus)
    grads = jax.block_until_ready(grads)

    # NumPy reference for the gradient formula.
    theta_np = ref_thetas[0]
    e_np = theta_np[None, :] - mus_np
    sq = np.sum(e_np * e_np, axis=-1, keepdims=True)
    diff = sq.T - sq
    denom = np.sum(np.exp(-0.5 * diff / sigma ** 2), axis=-1, keepdims=True)
    ref_grad = e_np / sigma ** 2 / denom * 1.0
    np.testing.assert_allclose(np.asarray(grads), ref_grad, rtol=1e-2, atol=1e-4)

    print("KERNEL_OK")
</pallas_src>

<mosaic_0001>
module attributes {stable_mosaic.version = 11 : i64} {
  func.func @_decode_kernel(%arg0: i32, %arg1: i32, %arg2: memref<4xi32, #tpu.memory_space<smem>>, %arg3: memref<4xf32, #tpu.memory_space<smem>>, %arg4: memref<1xf32, #tpu.memory_space<smem>>, %arg5: memref<1x1x512xf32, #tpu.memory_space<vmem>>, %arg6: memref<1x1x512xf32, #tpu.memory_space<vmem>>, %arg7: memref<1x1x512xf32, #tpu.memory_space<vmem>>) attributes {dimension_semantics = [#tpu.dimension_semantics<parallel>, #tpu.dimension_semantics<parallel>], iteration_bounds = array<i64: 4, 2>, scalar_prefetch = 1 : i64, scratch_operands = 0 : i64, tpu.core_type = #tpu.core_type<tc>, window_params = [{transform_indices = @transform_0, window_bounds = array<i64: 4>}, {transform_indices = @transform_1, window_bounds = array<i64: 1>}, {transform_indices = @transform_2, window_bounds = array<i64: 1, 1, 512>}, {transform_indices = @transform_3, window_bounds = array<i64: 1, 1, 512>}, {transform_indices = @transform_4, window_bounds = array<i64: 1, 1, 512>}]} {
    %c0 = arith.constant 0 : index
    %c0_0 = arith.constant 0 : index
    %c0_1 = arith.constant 0 : index
    %0 = vector.load %arg5[%c0, %c0_0, %c0_1] : memref<1x1x512xf32, #tpu.memory_space<vmem>>, vector<1x1x512xf32>
    %1 = arith.index_cast %arg0 : i32 to index
    %2 = memref.load %arg3[%1] : memref<4xf32, #tpu.memory_space<smem>>
    %c0_2 = arith.constant 0 : index
    %3 = memref.load %arg4[%c0_2] : memref<1xf32, #tpu.memory_space<smem>>
    %4 = arith.mulf %2, %3 : f32
    %c0_3 = arith.constant 0 : index
    %c0_4 = arith.constant 0 : index
    %c0_5 = arith.constant 0 : index
    %5 = vector.load %arg6[%c0_3, %c0_4, %c0_5] : memref<1x1x512xf32, #tpu.memory_space<vmem>>, vector<1x1x512xf32>
    %6 = vector.broadcast %4 : f32 to vector<1x1x512xf32>
    %7 = arith.mulf %6, %5 : vector<1x1x512xf32>
    %8 = arith.addf %0, %7 : vector<1x1x512xf32>
    %c0_6 = arith.constant 0 : index
    %c0_7 = arith.constant 0 : index
    %c0_8 = arith.constant 0 : index
    %9 = vector.load %arg7[%c0_6, %c0_7, %c0_8] : memref<1x1x512xf32, #tpu.memory_space<vmem>>, vector<1x1x512xf32>
    tpu.vector_store %arg7[%c0_6, %c0_7, %c0_8], %8 {strides = array<i32>} : memref<1x1x512xf32, #tpu.memory_space<vmem>>, vector<1x1x512xf32>,
    return
  }
  func.func @transform_0(%arg0: i32, %arg1: i32, %arg2: memref<4xi32, #tpu.memory_space<smem>>) -> i32 {
    %c0_i32 = arith.constant 0 : i32
    %c0_i32_0 = arith.constant 0 : i32
    return %c0_i32 : i32
  }
  func.func @transform_1(%arg0: i32, %arg1: i32, %arg2: memref<4xi32, #tpu.memory_space<smem>>) -> i32 {
    %c0_i32 = arith.constant 0 : i32
    %c0_i32_0 = arith.constant 0 : i32
    return %c0_i32 : i32
  }
  func.func @transform_2(%arg0: i32, %arg1: i32, %arg2: memref<4xi32, #tpu.memory_space<smem>>) -> (i32, i32, i32) {
    %0 = arith.index_cast %arg0 : i32 to index
    %1 = memref.load %arg2[%0] : memref<4xi32, #tpu.memory_space<smem>>
    %c0_i32 = arith.constant 0 : i32
    %c0_i32_0 = arith.constant 0 : i32
    return %1, %c0_i32, %arg1 : i32, i32, i32
  }
  func.func @transform_3(%arg0: i32, %arg1: i32, %arg2: memref<4xi32, #tpu.memory_space<smem>>) -> (i32, i32, i32) {
    %c0_i32 = arith.constant 0 : i32
    %c0_i32_0 = arith.constant 0 : i32
    return %arg0, %c0_i32, %arg1 : i32, i32, i32
  }
  func.func @transform_4(%arg0: i32, %arg1: i32, %arg2: memref<4xi32, #tpu.memory_space<smem>>) -> (i32, i32, i32) {
    %c0_i32 = arith.constant 0 : i32
    %c0_i32_0 = arith.constant 0 : i32
    return %arg0, %c0_i32, %arg1 : i32, i32, i32
  }
}

</mosaic_0001>

<bundles_post_ra>
// kernel: tpu_custom_call.1
= control target key start
LH: loop header
LB: loop body
LE: loop exit
PB: predicated region body
PF: predicated region fallthrough
CT: control target
= control target key end

     0   :  { %s825_s23 = smov [#allocation3]   ;;  %s1140_s0 = inlined_call_operand.vmem [shape: s32[4], index: 0, kind: input, shape index: {}]   ;;  %s1141_s1 = inlined_call_operand.vmem [shape: f32[4], index: 1, kind: input, shape index: {}]   ;;  %s1142_s2 = inlined_call_operand.<no memory space> [shape: f32[1], index: 2, kind: input, shape index: {}]   ;;  %s1143_s3 = inlined_call_operand.hbm [shape: f32[4,1,1024], index: 3, kind: input, shape index: {}]   ;;  %s1144_s4 = inlined_call_operand.hbm [shape: f32[4,1,1024], index: 4, kind: input, shape index: {}]   ;;  %s1145_s5 = inlined_call_operand.hbm [shape: f32[4,1,1024], index: 5, kind: output, shape index: {}]  }
   0x1   :  { %1155 = sst [smem:[#allocation26_spill]] %s1141_s1  ;;  %s11_s20 = sshll.u32 %s1140_s0, 4  ;;  %s12_s20 = int_to_ptr.vmem [resolvable:$true] %s11_s20 }
   0x2   :  { %1156 = sst [smem:[#allocation27_spill]] %s1143_s3 }
   0x3   :  { %1157 = sst [smem:[#allocation28_spill]] %s1145_s5 }
   0x4   :  { %15 = sst [smem:[#allocation4]] %s1142_s2 }
   0x5   :  { %14 = dma.vmem_to_smem %s12_s20, 16, %s825_s23, [#allocation2] }
   0x6   :  { %763 = dma.done.wait [#allocation2], 16 }
   0x7   :  { %764 = vsyncadd [#allocation2], 4294967280 }
   0x8   :  { %18 = sfence }
   0x9   :  { %19 = vsyncpa [#allocation8], 0 }
   0xa   :  { %20 = vsyncpa [#allocation6], 0 }
   0xb   :  { %22 = vsyncpa [#allocation6 + $0x1], 0 }
   0xc   :  { %23 = vsyncpa [#allocation11], 0 }
   0xd   :  { %25 = vsyncpa [#allocation11 + $0x1], 0 }
   0xe   :  { %26 = vsyncpa [#allocation7], 0 }
   0xf   :  { %28 = vsyncpa [#allocation7 + $0x1], 0  ;;  %s863_s24 = smov 0   ;;  %s865_s0 = smov 0  }
  0x10   :  { %s867_s25 = smov 0   ;;  %s869_s2 = smov 0  }
  0x11   :  { %s871_s26 = smov 0   ;;  %s873_s27 = smov 0  }
  0x12   :  { %s875_s28 = smov 0   ;;  %s877_s29 = smov 0  }
  0x13   :  { %s879_s30 = smov 0   ;;  %s881_s6 = smov 0  }
  0x14   :  { %s883_s7 = smov 0  }
  0x15 LB: > { %1158 = sst [smem:[#allocation20_spill]] %s803_s27  ;;  %s460_s8 = sadd.s32 4294967295, %s823_s7   ;;  %s823_s7 = sphi %s883_s7, %s34_s7   ;;  %s819_s6 = sphi %s881_s6, %s1200_s6   ;;  %s815_s30 = sphi %s879_s30, %s1199_s30   ;;  %s811_s29 = sphi %s877_s29, %s1198_s29   ;;  %s807_s28 = sphi %s875_s28, %s1197_s28   ;;  %s803_s27 = sphi %s873_s27, %s1189_s27   ;;  %s799_s26 = sphi %s871_s26, %s1196_s26   ;;  %s795_s2 = sphi %s869_s2, %s1195_s2   ;;  %s791_s25 = sphi %s867_s25, %s1194_s25   ;;  %s787_s0 = sphi %s865_s0, %s1193_s0   ;;  %s783_s24 = sphi %s863_s24, %s1192_s24  }
  0x16   : > { %1159 = sst [smem:[#allocation21_spill]] %s807_s28  ;;  %p112_p0 = scmp.ne.s32.totalorder %s799_s26, %s795_s2 }
  0x17   : > { %p918_p1 = scmp.eq.s32.totalorder %s460_s8, 0  ;;  %p922_p2 = scmp.eq.s32.totalorder %s460_s8, 7 }
  0x18   : > { %p462_p3 = scmp.ge.s32.totalorder %s823_s7, 1  ;;  %p179_p4 = scmp.lt.s32.totalorder %s823_s7, 9 }
  0x19   : > { %p930_p5 = por %p918_p1, %p112_p0  ;;  %s1164_s1 = sld [smem:[#allocation26_spill]] }
  0x1a   : > { %p934_p6 = pnand %p462_p3, %p179_p4  ;;  %s826_s16 = smov [#allocation5]  }
  0x1b   : > { %s43_s17 = sadd.s32 1, %s815_s30  ;;  %s46_s18 = sadd.s32 1, %s819_s6 }
  0x1c   : > { %p493_p7 = pneg %p934_p6  ;;  %p44_p9 = scmp.ge.s32.totalorder %s43_s17, 2 }
  0x1d   : > { %s92_s19 = sld [smem:[#allocation3 + %s819_s6]]  ;;  %s99_s20 = sadd.s32 1, %s803_s27 }
  0x1e   : > { %p494_p8 = pnand %p493_p7, %p918_p1  ;;  %p106_p10 = scmp.ne.s32.totalorder %s803_s27, %s799_s26 }
  0x1f   : > { %s191_s15 = sshll.u32 %s1164_s1, 4  ;;  %s1202_s17 = smov (%p44_p9, %s43_s17), 0  ;;  %s192_s15 = int_to_ptr.vmem [resolvable:$true] %s191_s15 }
  0x20   : > { %496 = dma.vmem_to_smem (!%p494_p8), %s192_s15, 16, %s826_s16, [#allocation8]  }
  0x21   : > { %1165 = sst [smem:[#allocation22_spill]] %s1202_s17  ;;  %s1204_s18 = smov (!%p44_p9, %s46_s18), %s819_s6 }
  0x22   : > { %s95_s21 = ssub.s32 %s815_s30, %s1202_s17  ;;  %p107_p11 = scmp.eq.s32.totalorder %s823_s7, 0 }
  0x23   : > { %p48_p12 = scmp.ge.s32.totalorder %s1204_s18, 4  ;;  %p1151_p13 = scmp.lt.s32.totalorder %s823_s7, 8 }
  0x24   : > { %p960_p0 = por %p107_p11, %p106_p10  ;;  %s1146_s23 = sand.u32 1, %s803_s27  }
  0x25   : > { %s1206_s18 = smov (%p48_p12, %s1204_s18), 0  ;;  %s465_s2 = sshll.u32 %s1146_s23, 2 }
  0x26   : > { %1167 = sst [smem:[#allocation23_spill]] %s1206_s18  ;;  %s122_s13 = ssub.s32 %s819_s6, %s1206_s18 }
  0x27   : > { %s93_s8 = sld [smem:[#allocation3 + %s1206_s18]]  ;;  %s124_s14 = sor.u32 %s122_s13, %s95_s21 }
  0x28   : > { %p125_p3 = scmp.eq.s32.totalorder %s124_s14, 0  ;;  %s209_s17 = scalar_lea.vmem [#allocation9], %s465_s2 }
  0x29   : > { %s483_s16 = scalar_select %p960_p0, [#allocation3], [#allocation13] }
  0x2a   : > { %s484_s1 = scalar_select %p960_p0, %s819_s6, 0 }
  0x2b   : > { %s1208_s16 = smov (!%p1151_p13, %s483_s16), [#allocation14]  ;;  %s980_s18 = sshll.u32 %s209_s17, 4 }
  0x2c   : > { %1168 = sst [smem:[#allocation24_spill]] %s980_s18  ;;  %p987_p7 = pnand %p1151_p13, %p960_p0 }
  0x2d   : > { %s94_s23 = ssub.s32 %s92_s19, %s93_s8  ;;  %s1210_s1 = smov (!%p1151_p13, %s484_s1), 0 }
  0x2e   : > { %s96_s13 = sor.u32 %s95_s21, %s94_s23  ;;  %s210_s19 = sld [smem:[%s1208_s16 + %s1210_s1]] }
  0x2f   : > { %p97_p4 = scmp.eq.s32.totalorder %s96_s13, 0  ;;  %s127_s21 = sadd.s32 1, %s791_s25 }
  0x30   : > { %s1000_s23 = scalar_select %p125_p3, %s791_s25, %s127_s21  }
  0x31   : > { %s994_s17 = scalar_select %p97_p4, %s803_s27, %s99_s20  }
  0x32   : > { %p134_p8 = scmp.ne.s32.totalorder %s791_s25, %s787_s0  ;;  %s1171_s22 = sshll.u32 %s815_s30, 2 }
  0x33   : > { %1170 = sst [smem:[#allocation25_spill]] %s994_s17  ;;  %p1152_p9 = scmp.ne.s32.totalorder %s787_s0, %s783_s24 }
  0x34   : > { %s467_s8 = sshll.u32 %s210_s19, 3  ;;  %s1172_s3 = sld [smem:[#allocation27_spill]] }
  0x35   : > { %s215_s13 = sadd.s32 %s467_s8, %s1171_s22  ;;  %p1013_p10 = por %p134_p8, %p107_p11 }
  0x36   : > { %p1022_p12 = por %p1152_p9, %p918_p1  ;;  %p1028_p0 = por %p922_p2, %p134_p8 }
  0x37   : > { %s1176_s5 = sand.u32 1, %s803_s27   ;;  %p635_p3 = pneg %p987_p7 }
  0x38   : > { %s1175_s16 = scalar_select %p1028_p0, 1, 0 }
  0x39   : > { %s206_s18 = scalar_lea.sflag [#allocation6], %s1176_s5 }
  0x3a   : > { %s216_s28 = scalar_lea.hbm %s1172_s3, %s215_s13  ;;  %s638_s22 = scalar_lea.hbm %s1172_s3, 32 }
  0x3b   : > { %s218_s1 = sshll.u32 %s216_s28, 4  ;;  %s219_s1 = int_to_ptr.hbm [resolvable:$true] %s218_s1 }
  0x3c   : > { %s631_s19 = sshra.s32 %s219_s1, 4  ;;  %s632_s19 = int_to_ptr.hbm [resolvable:$true] %s631_s19 }
  0x3d   : > { %s633_s21 = scalar_lea.hbm %s632_s19, 4  ;;  %p639_p2 = scmp.lt.s32.totalorder %s632_s19, %s1172_s3 }
  0x3e   : > { %p634_p11 = scmp.ne.s32.totalorder %s632_s19, %s633_s21  ;;  %p640_p8 = scmp.lt.s32.totalorder %s638_s22, %s633_s21 }
  0x40   : > { %p636_p4 = pnand %p635_p3, %p634_p11  ;;  %p641_p9 = por %p640_p8, %p639_p2 }
  0x42   : > { %p637_p13 = pneg %p636_p4 }
  0x44   : > { %p642_p0 = pnand %p641_p9, %p637_p13 }
  0x46   : > { %645 = shalt.err (!%p642_p0)
}
  0x47   : > { %s1177_s5 = sld [smem:[#allocation24_spill]]  ;;  %s1179_s28 = sadd.s32 4294967294, %s823_s7  }
  0x48   : > { %p172_p11 = scmp.eq.s32.totalorder %s1179_s28, 7  ;;  %s227_s19 = sand.u32 1, %s791_s25  }
  0x49   : > { %s468_s21 = sshll.u32 %s227_s19, 2  ;;  %p1180_p3 = scmp.ne.s32.totalorder %s787_s0, %s783_s24 }
  0x4a   : > { %s470_s15 = sshll.u32 %s819_s6, 3  ;;  %s231_s22 = scalar_lea.vmem [#allocation10], %s468_s21 }
  0x4b   : > { %p1052_p13 = por %p172_p11, %p1180_p3  ;;  %s241_s13 = sshll.u32 %s231_s22, 4  ;;  %s242_s13 = int_to_ptr.vmem [resolvable:$true] %s241_s13 }
  0x4c   : > { %s1182_s10 = sshll.u32 %s815_s30, 2 }
  0x4d   : > { %s1178_s2 = int_to_ptr.vmem [resolvable:$true] %s1177_s5  ;;  %s236_s5 = sadd.s32 %s470_s15, %s1182_s10 }
  0x4e   : > { %502 = dma.hbm_to_vmem [thread:$0]  (!%p987_p7), %s219_s1, 64, %s1178_s2, %s206_s18  }
  0x4f   : > { %s237_s27 = scalar_lea.hbm %s1144_s4, %s236_s5  ;;  %p1183_p7 = scmp.lt.s32.totalorder %s823_s7, 8 }
  0x50   : > { %s239_s2 = sshll.u32 %s237_s27, 4  ;;  %s228_s1 = scalar_lea.sflag [#allocation11], %s227_s19  ;;  %s240_s2 = int_to_ptr.hbm [resolvable:$true] %s239_s2 }
  0x51   : > { %p503_p9 = pnand %p1183_p7, %p1013_p10  ;;  %250 = sbr.rel (%p934_p6) target bundleno = 120 (0x78), region = 36 }
  0x53   : > { %505 = dma.hbm_to_vmem [thread:$0]  (!%p503_p9), %s240_s2, 64, %s242_s13, %s228_s1  }
  0x56   : > { %766 = dma.done.wait (%p918_p1), [#allocation8], 16  }
  0x57   : > { %768 = vsyncadd (%p918_p1), [#allocation8], 4294967280  ;;  %s257_s3 = sand.u32 1, %s799_s26  }
  0x58   : > { %s473_s17 = sshll.u32 %s257_s3, 2  ;;  %s258_s20 = scalar_lea.sflag [#allocation6], %s257_s3 }
  0x59   : > { %s261_s18 = scalar_lea.vmem [#allocation9], %s473_s17 }
  0x5a   : > { %770 = dma.done.wait (%p930_p5), %s258_s20, 64  }
  0x5b   : > { %772 = vsyncadd (%p930_p5), %s258_s20, 4294967232  ;;  %s1078_s27 = sand.u32 1, %s787_s0  }
  0x5c   : > { %s474_s12 = sshll.u32 %s1078_s27, 2  ;;  %s268_s9 = scalar_lea.sflag [#allocation11], %s1078_s27 }
  0x5d   : > { %s271_s28 = scalar_lea.vmem [#allocation10], %s474_s12 }
  0x5e   : > { %774 = dma.done.wait (%p1022_p12), %s268_s9, 64  }
  0x5f   : > { %776 = vsyncadd (%p1022_p12), %s268_s9, 4294967232 }
  0x60   : > { %277 = sfence }
  0x61   : > { %s1184_s19 = sld [smem:[#allocation21_spill]]  ;;  %s478_s22 = sshll.u32 %s811_s29, 3  ;;  %v311_v0 = vld [vmem:[%s271_s28] sm:$0xf]  ;;  %v315_v1 = vlaneseq  ;;  %v307_v2 = vld [vmem:[%s261_s18] sm:$0xf] }
  0x62   : > { %s308_s11 = sld [smem:[#allocation5 + %s811_s29]]  ;;  %s302_s20 = scalar_lea.vmem [#allocation12], %s474_s12 }
  0x63   : > { %s309_s21 = sld [smem:[#allocation4]]  ;;  %s335_s14 = sshll.u32 %s302_s20, 4  ;;  %vm317_vm0 = vcmp.lt.s32.totalorder %v315_v1, 512  ;;  %s336_s14 = int_to_ptr.vmem [resolvable:$true] %s335_s14 }
  0x64   : > { %s1185_s2 = sld [smem:[#allocation28_spill]]  ;;  %s321_s29 = scalar_lea.sflag [#allocation7], %s1078_s27 }
  0x65   : > { %p1187_p5 = scmp.ne.s32.totalorder %s1175_s16, 0 }
  0x67   : > { %s477_s15 = sshll.u32 %s1184_s19, 2 }
  0x68   : > { %s332_s13 = sadd.s32 %s478_s22, %s477_s15 }
  0x69   : > { %s310_s17 = smul.f32 %s309_s21, %s308_s11 }
  0x6a   : > { %s1186_s1 = smov %s1185_s2  ;;  %s333_s3 = scalar_lea.hbm %s1185_s2, %s332_s13 }
  0x6b   : > { %v312_v3 = vstv %s310_s17  ;;  %s337_s9 = sshll.u32 %s333_s3, 4  ;;  %s711_s18 = scalar_lea.hbm %s1186_s1, 32  ;;  %s338_s9 = int_to_ptr.hbm [resolvable:$true] %s337_s9 }
  0x6c   : > { %v313_v4 = vmul.f32 %v312_v3, %v311_v0  ;;  %s705_s19 = sshra.s32 %s338_s9, 4  ;;  %s706_s19 = int_to_ptr.hbm [resolvable:$true] %s705_s19 }
  0x6d   : > { %s707_s15 = scalar_lea.hbm %s706_s19, 4  ;;  %p712_p12 = scmp.lt.s32.totalorder %s706_s19, %s1186_s1 }
  0x6e   : > { %v314_v5 = vadd.f32 %v313_v4, %v307_v2  ;;  %p708_p1 = scmp.ne.s32.totalorder %s706_s19, %s707_s15  ;;  %p713_p0 = scmp.lt.s32.totalorder %s711_s18, %s707_s15 }
  0x70   : > { %319 = vst.msk [vmem:[%s302_s20] sm:$0xf] %vm317_vm0, %v314_v5  ;;  %p709_p6 = pnand %p708_p1, %p1187_p5  ;;  %p714_p4 = por %p713_p0, %p712_p12 }
  0x72   : > { %p710_p10 = pneg %p709_p6 }
  0x74   : > { %p715_p2 = pnand %p714_p4, %p710_p10 }
  0x76   : > { %718 = shalt.err (!%p715_p2)
}
  0x77   : > { %491 = dma.vmem_to_hbm [thread:$0]  (%p1187_p5), %s336_s14, 64, %s338_s9, %s321_s29  }
  0x78 PF: > { %p513_p8 = scmp.ge.s32.totalorder %s823_s7, 2  ;;  %s349_s27 = sand.u32 1, %s783_s24  }
  0x79   : > { %s350_s22 = scalar_lea.sflag [#allocation7], %s349_s27 }
  0x7a   : > { %p507_p11 = pnand %p513_p8, %p1052_p13 }
  0x7c   : > { %p508_p3 = pneg %p507_p11 }
  0x7e   : > { %778 = dma.done.wait (%p508_p3), %s350_s22, 64  }
  0x7f   : > { %780 = vsyncadd (%p508_p3), %s350_s22, 4294967232  ;;  %s34_s7 = sadd.s32 1, %s823_s7   ;;  %s1188_s16 = sld [smem:[#allocation20_spill]] }
  0x80   : > { %p31_p7 = scmp.ge.s32.totalorder %s34_s7, 10   ;;  %s1189_s27 = sld [smem:[#allocation25_spill]] }
  0x81   : > { %s1190_s13 = sld [smem:[#allocation22_spill]]  ;;  %s1192_s24 = smov %s787_s0 }
  0x82   : > { %s1191_s10 = sld [smem:[#allocation23_spill]]  ;;  %s1193_s0 = smov %s791_s25 }
  0x83   : > { %s1194_s25 = smov %s1000_s23  ;;  %s1195_s2 = smov %s799_s26 }
  0x84   : > { %s1197_s28 = smov %s815_s30  ;;  %s1198_s29 = smov %s819_s6 }
  0x85   : > { %s1196_s26 = smov %s1188_s16  ;;  %33 = sbr.rel (!%p31_p7) target bundleno = 21 (0x15), region = 99 }
  0x87   : > { %s1199_s30 = smov %s1190_s13 }
  0x88   : > { %s1200_s6 = smov %s1191_s10 }
  0x8a   :  { %356 = vsyncpa [#allocation6], 1 }
  0x8b   :  { %358 = vsyncpa [#allocation6 + $0x1], 1 }
  0x8c   :  { %359 = vsyncpa [#allocation11], 1 }
  0x8d   :  { %361 = vsyncpa [#allocation11 + $0x1], 1 }
  0x8e   :  { %362 = vsyncpa [#allocation7], 1 }
  0x8f   :  { %364 = vsyncpa [#allocation7 + $0x1], 1 }
  0x90   :  { %365 = vsyncpa [#allocation8], 1 }
  0x91   :  { %367 = vsyncpa [#allocation8 + $0x1], 1 }

</bundles_post_ra>
